<compile_context>
chip_gen: v5e
topology: v5e:2x2
jax: 0.10.0
libtpu: 0.0.40
codegen_flags: <defaults>
</compile_context>

<pallas_src>
import functools
import math

import jax
import jax.numpy as jnp
from jax import lax
from jax.experimental import pallas as pl
from jax.experimental.pallas import tpu as pltpu

_LANES = 128
_INNER_ROWS = 1024               # rows per in-kernel compute chunk (bounds VMEM temporaries)
_TARGET_BLOCK_BYTES = 4 << 20    # ~4 MiB of HBM traffic per input per grid step
_VMEM_LIMIT_BYTES = 32 << 20     # raise v5e's 16 MiB scoped default; == default on v6e/v7x


def _round_up(x, m):
    return ((x + m - 1) // m) * m


def _num_tensorcores():
    """Best-effort TensorCores-per-chip detection (2 on v7x, 1 on v5e/v6e).

    Falls back to 1 (the safe single-core path) if the info isn't exposed.
    """
    try:
        info = pltpu.get_tpu_info()
    except Exception:
        return 1
    for name in ("num_cores", "cores_per_chip", "num_cores_per_chip",
                 "num_tensorcores", "tensorcores_per_chip"):
        v = getattr(info, name, None)
        if isinstance(v, int) and v >= 1:
            return max(1, min(int(v), 2))
    return 1


def _angular_sq(diff):
    """(fmod(diff + 180, 360) - 180)**2 with torch.fmod (trunc-remainder) semantics."""
    x = diff + 180.0
    q = x / 360.0                                        # true divide (no recip-mul quotient flip)
    qt = jnp.where(q < 0.0, jnp.ceil(q), jnp.floor(q))   # trunc(q); propagates NaN/Inf like torch
    adj = x - qt * 360.0 - 180.0
    return adj * adj


def _loss_degree_kernel(pred_ref, lab_ref, out_ref, *,
                        rows, block_rows, inner_rows, full_blocks,
                        chunks_per_split):
    c = pl.program_id(0)            # core-split axis (CORE_PARALLEL when >1 TC)
    i = pl.program_id(1)            # reduction (row-block) axis
    b = c * chunks_per_split + i    # logical row-block index
    n_inner = block_rows // inner_rows

    @pl.when(i == 0)
    def _init():
        out_ref[...] = jnp.zeros_like(out_ref)

    def _accumulate(masked):
        def body(j, acc):
            start = pl.multiple_of(j * inner_rows, 8)
            p = pred_ref[pl.ds(start, inner_rows), :].astype(jnp.float32)
            l = lab_ref[pl.ds(start, inner_rows), :].astype(jnp.float32)
            d = p - l
            if masked:
                row_ids = lax.broadcasted_iota(jnp.int32, (inner_rows, _LANES), 0)
                valid = (b * block_rows + start + row_ids) < rows
                d = jnp.where(valid, d, 0.0)
            sq = _angular_sq(d)
            # Fold the (inner_rows, 128) chunk down to one (8, 128) vreg tile
            # with pure VPU adds; cross-sublane work is deferred to the wrapper.
            return acc + sq.reshape(inner_rows // 8, 8, _LANES).sum(axis=0)

        acc0 = jnp.zeros((8, _LANES), jnp.float32)
        out_ref[...] += lax.fori_loop(0, n_inner, body, acc0)

    # Hot path: block lies entirely inside the valid rows -> no masking work.
    @pl.when(b < full_blocks)
    def _full():
        _accumulate(masked=False)

    # Ragged / clamped path: the (at most one per split) partial block, plus any
    # clamped out-of-range grid steps (fully masked to zero contribution).
    @pl.when(b >= full_blocks)
    def _ragged():
        _accumulate(masked=True)


def loss_degree(predictions, labels, *, max_block_rows=None):
    """Pallas implementation of LossDegree.forward -> scalar angular RMSE (f32)."""
    assert predictions.shape == labels.shape
    n = math.prod(predictions.shape)

    pred = predictions.reshape(-1)
    lab = labels.reshape(-1)

    n_bulk = (n // _LANES) * _LANES
    rows = n_bulk // _LANES

    # Ragged tail (< 128 elements): tiny pure-JAX epilogue, same formula as the
    # kernel (avoids materializing a padded copy of the whole input in HBM).
    if n_bulk < n:
        d_tail = pred[n_bulk:].astype(jnp.float32) - lab[n_bulk:].astype(jnp.float32)
        tail_sum = jnp.sum(_angular_sq(d_tail))
    else:
        tail_sum = jnp.float32(0.0)

    if rows == 0:
        # Input smaller than one 128-lane row: pure-JAX fallback.
        total = tail_sum
    else:
        pred2 = (pred if n_bulk == n else pred[:n_bulk]).reshape(rows, _LANES)
        lab2 = (lab if n_bulk == n else lab[:n_bulk]).reshape(rows, _LANES)

        if max_block_rows is not None:
            cap = max(8, _round_up(int(max_block_rows), 8))
        else:
            # ~4 MiB of HBM per input per grid step regardless of dtype width
            # (bf16/f16 inputs get 2x the rows for the same byte footprint).
            itemsize = jnp.dtype(predictions.dtype).itemsize
            cap = max(_INNER_ROWS,
                      (_TARGET_BLOCK_BYTES // (_LANES * itemsize))
                      // _INNER_ROWS * _INNER_ROWS)

        block_rows = min(cap, _round_up(rows, 8))
        inner_rows = min(_INNER_ROWS, block_rows)
        block_rows = _round_up(block_rows, inner_rows)

        num_blocks = pl.cdiv(rows, block_rows)
        full_blocks = rows // block_rows          # blocks needing no masking

        num_cores = _num_tensorcores()
        num_splits = max(1, min(num_cores, num_blocks))
        chunks_per_split = pl.cdiv(num_blocks, num_splits)

        kernel = functools.partial(
            _loss_degree_kernel,
            rows=rows, block_rows=block_rows, inner_rows=inner_rows,
            full_blocks=full_blocks, chunks_per_split=chunks_per_split)

        def in_map(c, i):
            b = c * chunks_per_split + i
            # Only the LAST split can step past num_blocks, and its last valid
            # block is exactly num_blocks-1, so clamped steps repeat the
            # previous block index (no extra HBM fetch) and are masked to zero.
            return (jnp.minimum(b, num_blocks - 1), 0)

        if num_splits > 1:
            dim_sem = (pltpu.CORE_PARALLEL, pltpu.ARBITRARY)   # real 2-TC split on v7x
        else:
            dim_sem = ("arbitrary", "arbitrary")               # single-TC: plain reduction

        partials = pl.pallas_call(
            kernel,
            out_shape=jax.ShapeDtypeStruct((num_splits * 8, _LANES), jnp.float32),
            grid=(num_splits, chunks_per_split),
            in_specs=[
                pl.BlockSpec((block_rows, _LANES), in_map),
                pl.BlockSpec((block_rows, _LANES), in_map),
            ],
            out_specs=pl.BlockSpec((8, _LANES), lambda c, i: (c, 0)),
            compiler_params=pltpu.CompilerParams(
                dimension_semantics=dim_sem,
                vmem_limit_bytes=_VMEM_LIMIT_BYTES,
            ),
        )(pred2, lab2)

        total = jnp.sum(partials, dtype=jnp.float32) + tail_sum

    # mean over the TRUE element count, then sqrt (tiny scalar epilogue).
    return jnp.sqrt(total / jnp.float32(n))


if __name__ == "__main__":
    key = jax.random.PRNGKey(0)
    kp, kl, kp2, kl2 = jax.random.split(key, 4)

    def reference(p, l):
        # pure-JAX reference (same fmod semantics as torch.fmod)
        d = p.astype(jnp.float32) - l.astype(jnp.float32)
        adj = jnp.fmod(d + 180.0, 360.0) - 180.0
        return jnp.sqrt(jnp.mean(adj * adj))

    # Primary: small degree-valued tensors (batch=2, channels=4, 16x16 spatial).
    shape = (2, 4, 16, 16)
    predictions = jax.random.uniform(kp, shape, jnp.float32, minval=-360.0, maxval=360.0)
    labels = jax.random.uniform(kl, shape, jnp.float32, minval=-360.0, maxval=360.0)

    rmse = jax.jit(loss_degree)(predictions, labels)
    jax.block_until_ready(rmse)
    ref = reference(predictions, labels)
    assert jnp.allclose(rmse, ref, rtol=1e-4, atol=1e-4), (rmse, ref)

    # Secondary: ragged shape + tiny block cap -> exercises multi-step
    # accumulation across the grid, the masked partial block, and the tail path.
    shape2 = (3, 5, 529)
    p2 = jax.random.uniform(kp2, shape2, jnp.float32, minval=-360.0, maxval=360.0)
    l2 = jax.random.uniform(kl2, shape2, jnp.float32, minval=-360.0, maxval=360.0)

    rmse2 = jax.jit(functools.partial(loss_degree, max_block_rows=8))(p2, l2)
    jax.block_until_ready(rmse2)
    ref2 = reference(p2, l2)
    assert jnp.allclose(rmse2, ref2, rtol=1e-4, atol=1e-4), (rmse2, ref2)

    print("KERNEL_OK")
</pallas_src>

<mosaic_0001>
module attributes {stable_mosaic.version = 11 : i64} {
  func.func @_loss_degree_kernel(%arg0: i32, %arg1: i32, %arg2: memref<16x128xf32, #tpu.memory_space<vmem>>, %arg3: memref<16x128xf32, #tpu.memory_space<vmem>>, %arg4: memref<8x128xf32, #tpu.memory_space<vmem>>) attributes {dimension_semantics = [#tpu.dimension_semantics<arbitrary>, #tpu.dimension_semantics<arbitrary>], iteration_bounds = array<i64: 1, 1>, scalar_prefetch = 0 : i64, scratch_operands = 0 : i64, tpu.core_type = #tpu.core_type<tc>, window_params = [{transform_indices = @transform_0, window_bounds = array<i64: 16, 128>}, {transform_indices = @transform_1, window_bounds = array<i64: 16, 128>}, {transform_indices = @transform_2, window_bounds = array<i64: 8, 128>}]} {
    %c1_i32 = arith.constant 1 : i32
    %0 = arith.muli %arg0, %c1_i32 : i32
    %1 = arith.addi %0, %arg1 : i32
    %c0_i32 = arith.constant 0 : i32
    %2 = arith.cmpi eq, %arg1, %c0_i32 : i32
    %3 = arith.extui %2 : i1 to i32
    %c0_i32_0 = arith.constant 0 : i32
    %4 = arith.cmpi ne, %3, %c0_i32_0 : i32
    scf.if %4 {
      %cst = arith.constant 0.000000e+00 : f32
      %11 = vector.broadcast %cst : f32 to vector<8x128xf32>
      %c0 = arith.constant 0 : index
      %c0_5 = arith.constant 0 : index
      %12 = vector.load %arg4[%c0, %c0_5] : memref<8x128xf32, #tpu.memory_space<vmem>>, vector<8x128xf32>
      tpu.vector_store %arg4[%c0, %c0_5], %11 {strides = array<i32>} : memref<8x128xf32, #tpu.memory_space<vmem>>, vector<8x128xf32>,
    } else {
    }
    %c1_i32_1 = arith.constant 1 : i32
    %5 = arith.cmpi slt, %1, %c1_i32_1 : i32
    %6 = arith.extui %5 : i1 to i32
    %c0_i32_2 = arith.constant 0 : i32
    %7 = arith.cmpi ne, %6, %c0_i32_2 : i32
    scf.if %7 {
      %cst = arith.constant 0.000000e+00 : f32
      %11 = vector.broadcast %cst : f32 to vector<8x128xf32>
      %c0 = arith.constant 0 : index
      %c0_5 = arith.constant 0 : index
      %12 = vector.load %arg4[%c0, %c0_5] : memref<8x128xf32, #tpu.memory_space<vmem>>, vector<8x128xf32>
      %c0_i32_6 = arith.constant 0 : i32
      %c16_i32 = arith.constant 16 : i32
      %13 = arith.muli %c0_i32_6, %c16_i32 : i32
      %14 = tpu.assume_multiple %13, 8 : i32
      %15 = arith.index_cast %14 : i32 to index
      %c0_7 = arith.constant 0 : index
      %16 = vector.load %arg2[%15, %c0_7] : memref<16x128xf32, #tpu.memory_space<vmem>>, vector<16x128xf32>
      %17 = arith.index_cast %14 : i32 to index
      %c0_8 = arith.constant 0 : index
      %18 = vector.load %arg3[%17, %c0_8] : memref<16x128xf32, #tpu.memory_space<vmem>>, vector<16x128xf32>
      %19 = arith.subf %16, %18 : vector<16x128xf32>
      %cst_9 = arith.constant 1.800000e+02 : f32
      %20 = vector.broadcast %cst_9 : f32 to vector<16x128xf32>
      %21 = arith.addf %19, %20 : vector<16x128xf32>
      %cst_10 = arith.constant 3.600000e+02 : f32
      %22 = vector.broadcast %cst_10 : f32 to vector<16x128xf32>
      %23 = arith.divf %21, %22 : vector<16x128xf32>
      %cst_11 = arith.constant 0.000000e+00 : f32
      %24 = vector.broadcast %cst_11 : f32 to vector<16x128xf32>
      %25 = arith.cmpf olt, %23, %24 : vector<16x128xf32>
      %26 = math.ceil %23 : vector<16x128xf32>
      %27 = math.floor %23 : vector<16x128xf32>
      %28 = arith.select %25, %26, %27 : vector<16x128xi1>, vector<16x128xf32>
      %cst_12 = arith.constant 3.600000e+02 : f32
      %29 = vector.broadcast %cst_12 : f32 to vector<16x128xf32>
      %30 = arith.mulf %28, %29 : vector<16x128xf32>
      %31 = arith.subf %21, %30 : vector<16x128xf32>
      %cst_13 = arith.constant 1.800000e+02 : f32
      %32 = vector.broadcast %cst_13 : f32 to vector<16x128xf32>
      %33 = arith.subf %31, %32 : vector<16x128xf32>
      %34 = arith.mulf %33, %33 : vector<16x128xf32>
      %35 = vector.shape_cast %34 : vector<16x128xf32> to vector<2x8x128xf32>
      %cst_14 = arith.constant dense<0.000000e+00> : vector<8x128xf32>
      %36 = vector.multi_reduction <add>, %35, %cst_14 [0] : vector<2x8x128xf32> to vector<8x128xf32>
      %37 = arith.addf %11, %36 : vector<8x128xf32>
      %c1_i32_15 = arith.constant 1 : i32
      %38 = arith.addf %12, %37 : vector<8x128xf32>
      %c0_16 = arith.constant 0 : index
      %c0_17 = arith.constant 0 : index
      %39 = vector.load %arg4[%c0_16, %c0_17] : memref<8x128xf32, #tpu.memory_space<vmem>>, vector<8x128xf32>
      tpu.vector_store %arg4[%c0_16, %c0_17], %38 {strides = array<i32>} : memref<8x128xf32, #tpu.memory_space<vmem>>, vector<8x128xf32>,
    } else {
    }
    %c1_i32_3 = arith.constant 1 : i32
    %8 = arith.cmpi sge, %1, %c1_i32_3 : i32
    %9 = arith.extui %8 : i1 to i32
    %c0_i32_4 = arith.constant 0 : i32
    %10 = arith.cmpi ne, %9, %c0_i32_4 : i32
    scf.if %10 {
      %cst = arith.constant 0.000000e+00 : f32
      %11 = vector.broadcast %cst : f32 to vector<8x128xf32>
      %c0 = arith.constant 0 : index
      %c0_5 = arith.constant 0 : index
      %12 = vector.load %arg4[%c0, %c0_5] : memref<8x128xf32, #tpu.memory_space<vmem>>, vector<8x128xf32>
      %c0_i32_6 = arith.constant 0 : i32
      %c16_i32 = arith.constant 16 : i32
      %13 = arith.muli %c0_i32_6, %c16_i32 : i32
      %14 = tpu.assume_multiple %13, 8 : i32
      %15 = arith.index_cast %14 : i32 to index
      %c0_7 = arith.constant 0 : index
      %16 = vector.load %arg2[%15, %c0_7] : memref<16x128xf32, #tpu.memory_space<vmem>>, vector<16x128xf32>
      %17 = arith.index_cast %14 : i32 to index
      %c0_8 = arith.constant 0 : index
      %18 = vector.load %arg3[%17, %c0_8] : memref<16x128xf32, #tpu.memory_space<vmem>>, vector<16x128xf32>
      %19 = arith.subf %16, %18 : vector<16x128xf32>
      %20 = tpu.iota {dimensions = array<i32: 0>} : vector<16x128xi32>
      %c16_i32_9 = arith.constant 16 : i32
      %21 = arith.muli %1, %c16_i32_9 : i32
      %22 = arith.addi %21, %14 : i32
      %23 = vector.broadcast %22 : i32 to vector<16x128xi32>
      %24 = arith.addi %23, %20 : vector<16x128xi32>
      %c16_i32_10 = arith.constant 16 : i32
      %25 = vector.broadcast %c16_i32_10 : i32 to vector<16x128xi32>
      %26 = arith.cmpi slt, %24, %25 : vector<16x128xi32>
      %cst_11 = arith.constant 0.000000e+00 : f32
      %27 = vector.broadcast %cst_11 : f32 to vector<16x128xf32>
      %28 = arith.select %26, %19, %27 : vector<16x128xi1>, vector<16x128xf32>
      %cst_12 = arith.constant 1.800000e+02 : f32
      %29 = vector.broadcast %cst_12 : f32 to vector<16x128xf32>
      %30 = arith.addf %28, %29 : vector<16x128xf32>
      %cst_13 = arith.constant 3.600000e+02 : f32
      %31 = vector.broadcast %cst_13 : f32 to vector<16x128xf32>
      %32 = arith.divf %30, %31 : vector<16x128xf32>
      %cst_14 = arith.constant 0.000000e+00 : f32
      %33 = vector.broadcast %cst_14 : f32 to vector<16x128xf32>
      %34 = arith.cmpf olt, %32, %33 : vector<16x128xf32>
      %35 = math.ceil %32 : vector<16x128xf32>
      %36 = math.floor %32 : vector<16x128xf32>
      %37 = arith.select %34, %35, %36 : vector<16x128xi1>, vector<16x128xf32>
      %cst_15 = arith.constant 3.600000e+02 : f32
      %38 = vector.broadcast %cst_15 : f32 to vector<16x128xf32>
      %39 = arith.mulf %37, %38 : vector<16x128xf32>
      %40 = arith.subf %30, %39 : vector<16x128xf32>
      %cst_16 = arith.constant 1.800000e+02 : f32
      %41 = vector.broadcast %cst_16 : f32 to vector<16x128xf32>
      %42 = arith.subf %40, %41 : vector<16x128xf32>
      %43 = arith.mulf %42, %42 : vector<16x128xf32>
      %44 = vector.shape_cast %43 : vector<16x128xf32> to vector<2x8x128xf32>
      %cst_17 = arith.constant dense<0.000000e+00> : vector<8x128xf32>
      %45 = vector.multi_reduction <add>, %44, %cst_17 [0] : vector<2x8x128xf32> to vector<8x128xf32>
      %46 = arith.addf %11, %45 : vector<8x128xf32>
      %c1_i32_18 = arith.constant 1 : i32
      %47 = arith.addf %12, %46 : vector<8x128xf32>
      %c0_19 = arith.constant 0 : index
      %c0_20 = arith.constant 0 : index
      %48 = vector.load %arg4[%c0_19, %c0_20] : memref<8x128xf32, #tpu.memory_space<vmem>>, vector<8x128xf32>
      tpu.vector_store %arg4[%c0_19, %c0_20], %47 {strides = array<i32>} : memref<8x128xf32, #tpu.memory_space<vmem>>, vector<8x128xf32>,
    } else {
    }
    return
  }
  func.func @transform_0(%arg0: i32, %arg1: i32) -> (i32, i32) {
    %c1_i32 = arith.constant 1 : i32
    %0 = arith.muli %arg0, %c1_i32 : i32
    %1 = arith.addi %0, %arg1 : i32
    %c0_i32 = arith.constant 0 : i32
    %2 = arith.minsi %1, %c0_i32 : i32
    %c0_i32_0 = arith.constant 0 : i32
    %c0_i32_1 = arith.constant 0 : i32
    return %2, %c0_i32_0 : i32, i32
  }
  func.func @transform_1(%arg0: i32, %arg1: i32) -> (i32, i32) {
    %c1_i32 = arith.constant 1 : i32
    %0 = arith.muli %arg0, %c1_i32 : i32
    %1 = arith.addi %0, %arg1 : i32
    %c0_i32 = arith.constant 0 : i32
    %2 = arith.minsi %1, %c0_i32 : i32
    %c0_i32_0 = arith.constant 0 : i32
    %c0_i32_1 = arith.constant 0 : i32
    return %2, %c0_i32_0 : i32, i32
  }
  func.func @transform_2(%arg0: i32, %arg1: i32) -> (i32, i32) {
    %c0_i32 = arith.constant 0 : i32
    %c0_i32_0 = arith.constant 0 : i32
    return %arg0, %c0_i32 : i32, i32
  }
}

</mosaic_0001>

<bundles_post_ra>
// kernel: loss_degree.1
= control target key start
LH: loop header
LB: loop body
LE: loop exit
PB: predicated region body
PF: predicated region fallthrough
CT: control target
= control target key end

     0   :  { %v201_v0 = vmov 360.0   ;;  %s232_s0 = inlined_call_operand.vmem [shape: f32[16,128], index: 0, kind: input, shape index: {}]   ;;  %s233_s1 = inlined_call_operand.vmem [shape: f32[16,128], index: 1, kind: input, shape index: {}]   ;;  %s234_s2 = inlined_call_operand.vmem [shape: f32[8,128], index: 2, kind: output, shape index: {}]  }
   0x1   :  { %199 = vrcp.f32 %v201_v0  ;;  %v86_v1 = vld [vmem:[%s232_s0] sm:$0xff]  ;;  %v87_v2 = vld [vmem:[%s232_s0 + $0x8] sm:$0xff] }
   0x2   :  { %v88_v3 = vld [vmem:[%s233_s1] sm:$0xff]  ;;  %v89_v4 = vld [vmem:[%s233_s1 + $0x8] sm:$0xff] }
   0x3   :  { %v90_v7 = vsub.f32 %v86_v1, %v88_v3  ;;  %v91_v8 = vsub.f32 %v87_v2, %v89_v4 }
   0x5   :  { %v92_v11 = vadd.f32 180.0, %v90_v7  ;;  %v93_v12 = vadd.f32 180.0, %v91_v8 }
   0x7   :  { %v200_v5 = vpop.eup %199 }
   0x8   :  { %v95_v6 = vmul.f32 360.0, %v200_v5  ;;  %vm99_vm0 = vweird.f32 %v200_v5 }
   0xa   :  { %v96_v9 = vsub.f32 1.0, %v95_v6 }
   0xc   :  { %v97_v10 = vmul.f32 %v200_v5, %v96_v9 }
   0xe   :  { %v98_v13 = vadd.f32 %v200_v5, %v97_v10 }
  0x10   :  { %v100_v14 = vsel %vm99_vm0, %v200_v5, %v98_v13 }
  0x11   :  { %v101_v15 = vmul.f32 %v100_v14, %v92_v11  ;;  %v102_v16 = vmul.f32 %v100_v14, %v93_v12 }
  0x13   :  { %vm103_vm1 = vcmp.lt.f32.partialorder %v101_v15, 0.0  ;;  %vm104_vm2 = vcmp.lt.f32.partialorder %v102_v16, 0.0  ;;  %v105_v17 = vceil.f32 %v101_v15  ;;  %v106_v18 = vceil.f32 %v102_v16 }
  0x14   :  { %v107_v19 = vfloor.f32 %v101_v15  ;;  %v108_v20 = vfloor.f32 %v102_v16 }
  0x16   :  { %v109_v21 = vsel %vm103_vm1, %v105_v17, %v107_v19  ;;  %v110_v22 = vsel %vm104_vm2, %v106_v18, %v108_v20 }
  0x17   :  { %v111_v23 = vmul.f32 360.0, %v109_v21  ;;  %v112_v24 = vmul.f32 360.0, %v110_v22 }
  0x19   :  { %v113_v25 = vsub.f32 %v92_v11, %v111_v23  ;;  %v114_v26 = vsub.f32 %v93_v12, %v112_v24 }
  0x1b   :  { %v193_v27 = vadd.f32 -180.0, %v113_v25  ;;  %v194_v28 = vadd.f32 -180.0, %v114_v26 }
  0x1d   :  { %v117_v29 = vmul.f32 %v193_v27, %v193_v27  ;;  %v118_v30 = vmul.f32 %v194_v28, %v194_v28 }
  0x1f   :  { %v119_v31 = vadd.f32 %v118_v30, %v117_v29 }
  0x21   :  { %122 = vst [vmem:[%s234_s2] sm:$0xff] %v119_v31 }

</bundles_post_ra>
